<compile_context>
chip_gen: v7x
topology: tpu7x:2x2x1
jax: 0.10.0
libtpu: 0.0.40
codegen_flags: <defaults>
</compile_context>

<pallas_src>
import math
import functools

import jax
import jax.numpy as jnp
from jax import lax
from jax.experimental import pallas as pl
from jax.experimental.pallas import tpu as pltpu


# ----------------------------- hyperparameters ------------------------------
D_MODEL = 32
N_HEADS = 4
D_KEYS = D_MODEL // N_HEADS          # 8
D_LLM = 64
HE = D_KEYS * N_HEADS                # 32

B = 2
L = 8
S = 16


# ------------------------------- fused kernel --------------------------------
def reprog_fused_kernel(tgt_ref, src_ref, val_ref,
                        wq_ref, bq_ref, wk_ref, bk_ref,
                        wv_ref, bv_ref, wo_ref, bo_ref,
                        out_ref, *, n_heads, d_keys):
    """Fused ReprogrammingLayer forward.

    tgt_ref : (B*L, d_model)  -- flattened query rows
    src_ref : (S, d_llm), val_ref : (S, d_llm)
    w*_ref  : pre-transposed weights (in_features, out_features)
    b*_ref  : biases (1, out_features)
    out_ref : (B*L, d_llm)
    """
    tgt = tgt_ref[...]
    src = src_ref[...]
    val = val_ref[...]

    # Q / K / V projections: one MXU pass each (no per-batch loop, no .T).
    q = jnp.dot(tgt, wq_ref[...], preferred_element_type=jnp.float32) + bq_ref[...]
    k = jnp.dot(src, wk_ref[...], preferred_element_type=jnp.float32) + bk_ref[...]
    v = jnp.dot(val, wv_ref[...], preferred_element_type=jnp.float32) + bv_ref[...]

    wo = wo_ref[...]                                   # (HE, d_llm)
    scale = 1.0 / math.sqrt(d_keys)

    acc = None
    for h in range(n_heads):                           # static unroll, H is tiny
        lo, hi = h * d_keys, (h + 1) * d_keys
        qh = q[:, lo:hi]                               # (BL, E)
        kh = k[:, lo:hi]                               # (S, E)
        vh = v[:, lo:hi]                               # (S, E)

        # scores[l, s] = sum_e q[l,e] * k[s,e]  (contract last-vs-last, no transpose)
        s = lax.dot_general(qh, kh, (((1,), (1,)), ((), ())),
                            preferred_element_type=jnp.float32) * scale
        m = jnp.max(s, axis=-1, keepdims=True)
        p = jnp.exp(s - m)
        a = p / jnp.sum(p, axis=-1, keepdims=True)     # softmax over S
        # dropout: identity (eval mode)

        oh = jnp.dot(a, vh, preferred_element_type=jnp.float32)          # (BL, E)
        # Fold the output projection per head (== concat(heads) @ Wo), no concatenate.
        contrib = jnp.dot(oh, wo[lo:hi, :], preferred_element_type=jnp.float32)
        acc = contrib if acc is None else acc + contrib

    out_ref[...] = acc + bo_ref[...]                   # (BL, d_llm), lane-dense store


# ------------------------------- wrapper -------------------------------------
def reprogramming_forward(target, source, value, params):
    wq, bq, wk, bk, wv, bv, wo, bo = (
        params["wq"], params["bq"], params["wk"], params["bk"],
        params["wv"], params["bv"], params["wo"], params["bo"],
    )
    Bn, Ln, d_model = target.shape
    Sn, d_llm = source.shape

    # Host-side prep (free / one-time): flatten batch rows, pre-transpose weights.
    tgt2d = target.reshape(Bn * Ln, d_model)
    wq_t, wk_t, wv_t, wo_t = wq.T, wk.T, wv.T, wo.T

    vmem = pl.BlockSpec(memory_space=pltpu.MemorySpace.VMEM)   # full array, resident in VMEM
    kern = functools.partial(reprog_fused_kernel, n_heads=N_HEADS, d_keys=D_KEYS)

    out2d = pl.pallas_call(
        kern,
        in_specs=[vmem] * 11,
        out_specs=vmem,
        out_shape=jax.ShapeDtypeStruct((Bn * Ln, d_llm), jnp.float32),
    )(tgt2d, source, value, wq_t, bq, wk_t, bk, wv_t, bv, wo_t, bo)

    return out2d.reshape(Bn, Ln, d_llm)


# --------------------------- reference (plain JAX) ---------------------------
def reprogramming_reference(target, source, value, params):
    wq, bq, wk, bk, wv, bv, wo, bo = (
        params["wq"], params["bq"], params["wk"], params["bk"],
        params["wv"], params["bv"], params["wo"], params["bo"],
    )
    Bn, Ln, _ = target.shape
    Sn, _ = source.shape
    H, E = N_HEADS, D_KEYS

    q = (target @ wq.T + bq).reshape(Bn, Ln, H, E)
    k = (source @ wk.T + bk).reshape(Sn, H, E)
    v = (value @ wv.T + bv).reshape(Sn, H, E)

    scale = 1.0 / math.sqrt(E)
    scores = jnp.einsum("blhe,she->bhls", q, k)
    a = jax.nn.softmax(scale * scores, axis=-1)
    o = jnp.einsum("bhls,she->blhe", a, v).reshape(Bn, Ln, H * E)
    return o @ wo.T + bo


# ---------------------------------- main --------------------------------------
if __name__ == "__main__":
    key = jax.random.PRNGKey(0)
    ks = jax.random.split(key, 16)

    def linear_params(kw, kb, out_f, in_f):
        bound = 1.0 / math.sqrt(in_f)
        w = jax.random.uniform(kw, (out_f, in_f), jnp.float32, -bound, bound)
        b = jax.random.uniform(kb, (1, out_f), jnp.float32, -bound, bound)
        return w, b

    wq, bq = linear_params(ks[0], ks[1], HE, D_MODEL)
    wk, bk = linear_params(ks[2], ks[3], HE, D_LLM)
    wv, bv = linear_params(ks[4], ks[5], HE, D_LLM)
    wo, bo = linear_params(ks[6], ks[7], D_LLM, HE)
    params = dict(wq=wq, bq=bq, wk=wk, bk=bk, wv=wv, bv=bv, wo=wo, bo=bo)

    target = jax.random.normal(ks[8], (B, L, D_MODEL), jnp.float32)
    source = jax.random.normal(ks[9], (S, D_LLM), jnp.float32)
    value = jax.random.normal(ks[10], (S, D_LLM), jnp.float32)

    out = reprogramming_forward(target, source, value, params)
    out = jax.block_until_ready(out)

    ref = reprogramming_reference(target, source, value, params)
    assert out.shape == (B, L, D_LLM), out.shape
    assert jnp.allclose(out, ref, atol=1e-4, rtol=1e-4), (
        f"max abs err {jnp.max(jnp.abs(out - ref))}")

    print("KERNEL_OK")
</pallas_src>

<mosaic_0001>
module attributes {stable_mosaic.version = 11 : i64} {
  func.func @reprog_fused_kernel(%arg0: memref<16x32xf32, #tpu.memory_space<vmem>>, %arg1: memref<16x64xf32, #tpu.memory_space<vmem>>, %arg2: memref<16x64xf32, #tpu.memory_space<vmem>>, %arg3: memref<32x32xf32, #tpu.memory_space<vmem>>, %arg4: memref<1x32xf32, #tpu.memory_space<vmem>>, %arg5: memref<64x32xf32, #tpu.memory_space<vmem>>, %arg6: memref<1x32xf32, #tpu.memory_space<vmem>>, %arg7: memref<64x32xf32, #tpu.memory_space<vmem>>, %arg8: memref<1x32xf32, #tpu.memory_space<vmem>>, %arg9: memref<32x64xf32, #tpu.memory_space<vmem>>, %arg10: memref<1x64xf32, #tpu.memory_space<vmem>>, %arg11: memref<16x64xf32, #tpu.memory_space<vmem>>) attributes {dimension_semantics = [], scalar_prefetch = 0 : i64, scratch_operands = 0 : i64, tpu.core_type = #tpu.core_type<tc>} {
    %c0 = arith.constant 0 : index
    %c0_0 = arith.constant 0 : index
    %0 = vector.load %arg0[%c0, %c0_0] : memref<16x32xf32, #tpu.memory_space<vmem>>, vector<16x32xf32>
    %c0_1 = arith.constant 0 : index
    %c0_2 = arith.constant 0 : index
    %1 = vector.load %arg1[%c0_1, %c0_2] : memref<16x64xf32, #tpu.memory_space<vmem>>, vector<16x64xf32>
    %c0_3 = arith.constant 0 : index
    %c0_4 = arith.constant 0 : index
    %2 = vector.load %arg2[%c0_3, %c0_4] : memref<16x64xf32, #tpu.memory_space<vmem>>, vector<16x64xf32>
    %c0_5 = arith.constant 0 : index
    %c0_6 = arith.constant 0 : index
    %3 = vector.load %arg3[%c0_5, %c0_6] : memref<32x32xf32, #tpu.memory_space<vmem>>, vector<32x32xf32>
    %cst = arith.constant dense<0.000000e+00> : vector<16x32xf32>
    %4 = tpu.matmul %0, %3, %cst {dimension_numbers = #tpu.dot_dimension_numbers<[1], [0], [0], [1], [0, 0, 1, 1], [], []>} : vector<16x32xf32>, vector<32x32xf32>, vector<16x32xf32> -> vector<16x32xf32>
    %c0_7 = arith.constant 0 : index
    %c0_8 = arith.constant 0 : index
    %5 = vector.load %arg4[%c0_7, %c0_8] : memref<1x32xf32, #tpu.memory_space<vmem>>, vector<1x32xf32>
    %6 = vector.broadcast %5 : vector<1x32xf32> to vector<16x32xf32>
    %7 = arith.addf %4, %6 : vector<16x32xf32>
    %c0_9 = arith.constant 0 : index
    %c0_10 = arith.constant 0 : index
    %8 = vector.load %arg5[%c0_9, %c0_10] : memref<64x32xf32, #tpu.memory_space<vmem>>, vector<64x32xf32>
    %cst_11 = arith.constant dense<0.000000e+00> : vector<16x32xf32>
    %9 = tpu.matmul %1, %8, %cst_11 {dimension_numbers = #tpu.dot_dimension_numbers<[1], [0], [0], [1], [0, 0, 1, 1], [], []>} : vector<16x64xf32>, vector<64x32xf32>, vector<16x32xf32> -> vector<16x32xf32>
    %c0_12 = arith.constant 0 : index
    %c0_13 = arith.constant 0 : index
    %10 = vector.load %arg6[%c0_12, %c0_13] : memref<1x32xf32, #tpu.memory_space<vmem>>, vector<1x32xf32>
    %11 = vector.broadcast %10 : vector<1x32xf32> to vector<16x32xf32>
    %12 = arith.addf %9, %11 : vector<16x32xf32>
    %c0_14 = arith.constant 0 : index
    %c0_15 = arith.constant 0 : index
    %13 = vector.load %arg7[%c0_14, %c0_15] : memref<64x32xf32, #tpu.memory_space<vmem>>, vector<64x32xf32>
    %cst_16 = arith.constant dense<0.000000e+00> : vector<16x32xf32>
    %14 = tpu.matmul %2, %13, %cst_16 {dimension_numbers = #tpu.dot_dimension_numbers<[1], [0], [0], [1], [0, 0, 1, 1], [], []>} : vector<16x64xf32>, vector<64x32xf32>, vector<16x32xf32> -> vector<16x32xf32>
    %c0_17 = arith.constant 0 : index
    %c0_18 = arith.constant 0 : index
    %15 = vector.load %arg8[%c0_17, %c0_18] : memref<1x32xf32, #tpu.memory_space<vmem>>, vector<1x32xf32>
    %16 = vector.broadcast %15 : vector<1x32xf32> to vector<16x32xf32>
    %17 = arith.addf %14, %16 : vector<16x32xf32>
    %c0_19 = arith.constant 0 : index
    %c0_20 = arith.constant 0 : index
    %18 = vector.load %arg9[%c0_19, %c0_20] : memref<32x64xf32, #tpu.memory_space<vmem>>, vector<32x64xf32>
    %19 = vector.extract_strided_slice %7 {offsets = [0, 0], sizes = [16, 8], strides = [1, 1]} : vector<16x32xf32> to vector<16x8xf32>
    %20 = vector.extract_strided_slice %12 {offsets = [0, 0], sizes = [16, 8], strides = [1, 1]} : vector<16x32xf32> to vector<16x8xf32>
    %21 = vector.extract_strided_slice %17 {offsets = [0, 0], sizes = [16, 8], strides = [1, 1]} : vector<16x32xf32> to vector<16x8xf32>
    %cst_21 = arith.constant dense<0.000000e+00> : vector<16x16xf32>
    %22 = tpu.matmul %19, %20, %cst_21 {dimension_numbers = #tpu.dot_dimension_numbers<[1], [1], [0], [0], [0, 0, 1, 0], [], []>} : vector<16x8xf32>, vector<16x8xf32>, vector<16x16xf32> -> vector<16x16xf32>
    %cst_22 = arith.constant 0.353553385 : f32
    %23 = vector.broadcast %cst_22 : f32 to vector<16x16xf32>
    %24 = arith.mulf %22, %23 : vector<16x16xf32>
    %cst_23 = arith.constant dense<0xFF800000> : vector<16xf32>
    %25 = vector.multi_reduction <maximumf>, %24, %cst_23 [1] : vector<16x16xf32> to vector<16xf32>
    %26 = vector.shape_cast %25 : vector<16xf32> to vector<16x1xf32>
    %27 = vector.broadcast %26 : vector<16x1xf32> to vector<16x16xf32>
    %28 = arith.subf %24, %27 : vector<16x16xf32>
    %29 = math.exp %28 : vector<16x16xf32>
    %cst_24 = arith.constant dense<0.000000e+00> : vector<16xf32>
    %30 = vector.multi_reduction <add>, %29, %cst_24 [1] : vector<16x16xf32> to vector<16xf32>
    %31 = vector.shape_cast %30 : vector<16xf32> to vector<16x1xf32>
    %32 = vector.broadcast %31 : vector<16x1xf32> to vector<16x16xf32>
    %33 = arith.divf %29, %32 : vector<16x16xf32>
    %cst_25 = arith.constant dense<0.000000e+00> : vector<16x8xf32>
    %34 = tpu.matmul %33, %21, %cst_25 {dimension_numbers = #tpu.dot_dimension_numbers<[1], [0], [0], [1], [0, 0, 1, 1], [], []>} : vector<16x16xf32>, vector<16x8xf32>, vector<16x8xf32> -> vector<16x8xf32>
    %35 = vector.extract_strided_slice %18 {offsets = [0, 0], sizes = [8, 64], strides = [1, 1]} : vector<32x64xf32> to vector<8x64xf32>
    %cst_26 = arith.constant dense<0.000000e+00> : vector<16x64xf32>
    %36 = tpu.matmul %34, %35, %cst_26 {dimension_numbers = #tpu.dot_dimension_numbers<[1], [0], [0], [1], [0, 0, 1, 1], [], []>} : vector<16x8xf32>, vector<8x64xf32>, vector<16x64xf32> -> vector<16x64xf32>
    %37 = vector.extract_strided_slice %7 {offsets = [0, 8], sizes = [16, 8], strides = [1, 1]} : vector<16x32xf32> to vector<16x8xf32>
    %38 = vector.extract_strided_slice %12 {offsets = [0, 8], sizes = [16, 8], strides = [1, 1]} : vector<16x32xf32> to vector<16x8xf32>
    %39 = vector.extract_strided_slice %17 {offsets = [0, 8], sizes = [16, 8], strides = [1, 1]} : vector<16x32xf32> to vector<16x8xf32>
    %cst_27 = arith.constant dense<0.000000e+00> : vector<16x16xf32>
    %40 = tpu.matmul %37, %38, %cst_27 {dimension_numbers = #tpu.dot_dimension_numbers<[1], [1], [0], [0], [0, 0, 1, 0], [], []>} : vector<16x8xf32>, vector<16x8xf32>, vector<16x16xf32> -> vector<16x16xf32>
    %cst_28 = arith.constant 0.353553385 : f32
    %41 = vector.broadcast %cst_28 : f32 to vector<16x16xf32>
    %42 = arith.mulf %40, %41 : vector<16x16xf32>
    %cst_29 = arith.constant dense<0xFF800000> : vector<16xf32>
    %43 = vector.multi_reduction <maximumf>, %42, %cst_29 [1] : vector<16x16xf32> to vector<16xf32>
    %44 = vector.shape_cast %43 : vector<16xf32> to vector<16x1xf32>
    %45 = vector.broadcast %44 : vector<16x1xf32> to vector<16x16xf32>
    %46 = arith.subf %42, %45 : vector<16x16xf32>
    %47 = math.exp %46 : vector<16x16xf32>
    %cst_30 = arith.constant dense<0.000000e+00> : vector<16xf32>
    %48 = vector.multi_reduction <add>, %47, %cst_30 [1] : vector<16x16xf32> to vector<16xf32>
    %49 = vector.shape_cast %48 : vector<16xf32> to vector<16x1xf32>
    %50 = vector.broadcast %49 : vector<16x1xf32> to vector<16x16xf32>
    %51 = arith.divf %47, %50 : vector<16x16xf32>
    %cst_31 = arith.constant dense<0.000000e+00> : vector<16x8xf32>
    %52 = tpu.matmul %51, %39, %cst_31 {dimension_numbers = #tpu.dot_dimension_numbers<[1], [0], [0], [1], [0, 0, 1, 1], [], []>} : vector<16x16xf32>, vector<16x8xf32>, vector<16x8xf32> -> vector<16x8xf32>
    %53 = vector.extract_strided_slice %18 {offsets = [8, 0], sizes = [8, 64], strides = [1, 1]} : vector<32x64xf32> to vector<8x64xf32>
    %cst_32 = arith.constant dense<0.000000e+00> : vector<16x64xf32>
    %54 = tpu.matmul %52, %53, %cst_32 {dimension_numbers = #tpu.dot_dimension_numbers<[1], [0], [0], [1], [0, 0, 1, 1], [], []>} : vector<16x8xf32>, vector<8x64xf32>, vector<16x64xf32> -> vector<16x64xf32>
    %55 = arith.addf %36, %54 : vector<16x64xf32>
    %56 = vector.extract_strided_slice %7 {offsets = [0, 16], sizes = [16, 8], strides = [1, 1]} : vector<16x32xf32> to vector<16x8xf32>
    %57 = vector.extract_strided_slice %12 {offsets = [0, 16], sizes = [16, 8], strides = [1, 1]} : vector<16x32xf32> to vector<16x8xf32>
    %58 = vector.extract_strided_slice %17 {offsets = [0, 16], sizes = [16, 8], strides = [1, 1]} : vector<16x32xf32> to vector<16x8xf32>
    %cst_33 = arith.constant dense<0.000000e+00> : vector<16x16xf32>
    %59 = tpu.matmul %56, %57, %cst_33 {dimension_numbers = #tpu.dot_dimension_numbers<[1], [1], [0], [0], [0, 0, 1, 0], [], []>} : vector<16x8xf32>, vector<16x8xf32>, vector<16x16xf32> -> vector<16x16xf32>
    %cst_34 = arith.constant 0.353553385 : f32
    %60 = vector.broadcast %cst_34 : f32 to vector<16x16xf32>
    %61 = arith.mulf %59, %60 : vector<16x16xf32>
    %cst_35 = arith.constant dense<0xFF800000> : vector<16xf32>
    %62 = vector.multi_reduction <maximumf>, %61, %cst_35 [1] : vector<16x16xf32> to vector<16xf32>
    %63 = vector.shape_cast %62 : vector<16xf32> to vector<16x1xf32>
    %64 = vector.broadcast %63 : vector<16x1xf32> to vector<16x16xf32>
    %65 = arith.subf %61, %64 : vector<16x16xf32>
    %66 = math.exp %65 : vector<16x16xf32>
    %cst_36 = arith.constant dense<0.000000e+00> : vector<16xf32>
    %67 = vector.multi_reduction <add>, %66, %cst_36 [1] : vector<16x16xf32> to vector<16xf32>
    %68 = vector.shape_cast %67 : vector<16xf32> to vector<16x1xf32>
    %69 = vector.broadcast %68 : vector<16x1xf32> to vector<16x16xf32>
    %70 = arith.divf %66, %69 : vector<16x16xf32>
    %cst_37 = arith.constant dense<0.000000e+00> : vector<16x8xf32>
    %71 = tpu.matmul %70, %58, %cst_37 {dimension_numbers = #tpu.dot_dimension_numbers<[1], [0], [0], [1], [0, 0, 1, 1], [], []>} : vector<16x16xf32>, vector<16x8xf32>, vector<16x8xf32> -> vector<16x8xf32>
    %72 = vector.extract_strided_slice %18 {offsets = [16, 0], sizes = [8, 64], strides = [1, 1]} : vector<32x64xf32> to vector<8x64xf32>
    %cst_38 = arith.constant dense<0.000000e+00> : vector<16x64xf32>
    %73 = tpu.matmul %71, %72, %cst_38 {dimension_numbers = #tpu.dot_dimension_numbers<[1], [0], [0], [1], [0, 0, 1, 1], [], []>} : vector<16x8xf32>, vector<8x64xf32>, vector<16x64xf32> -> vector<16x64xf32>
    %74 = arith.addf %55, %73 : vector<16x64xf32>
    %75 = vector.extract_strided_slice %7 {offsets = [0, 24], sizes = [16, 8], strides = [1, 1]} : vector<16x32xf32> to vector<16x8xf32>
    %76 = vector.extract_strided_slice %12 {offsets = [0, 24], sizes = [16, 8], strides = [1, 1]} : vector<16x32xf32> to vector<16x8xf32>
    %77 = vector.extract_strided_slice %17 {offsets = [0, 24], sizes = [16, 8], strides = [1, 1]} : vector<16x32xf32> to vector<16x8xf32>
    %cst_39 = arith.constant dense<0.000000e+00> : vector<16x16xf32>
    %78 = tpu.matmul %75, %76, %cst_39 {dimension_numbers = #tpu.dot_dimension_numbers<[1], [1], [0], [0], [0, 0, 1, 0], [], []>} : vector<16x8xf32>, vector<16x8xf32>, vector<16x16xf32> -> vector<16x16xf32>
    %cst_40 = arith.constant 0.353553385 : f32
    %79 = vector.broadcast %cst_40 : f32 to vector<16x16xf32>
    %80 = arith.mulf %78, %79 : vector<16x16xf32>
    %cst_41 = arith.constant dense<0xFF800000> : vector<16xf32>
    %81 = vector.multi_reduction <maximumf>, %80, %cst_41 [1] : vector<16x16xf32> to vector<16xf32>
    %82 = vector.shape_cast %81 : vector<16xf32> to vector<16x1xf32>
    %83 = vector.broadcast %82 : vector<16x1xf32> to vector<16x16xf32>
    %84 = arith.subf %80, %83 : vector<16x16xf32>
    %85 = math.exp %84 : vector<16x16xf32>
    %cst_42 = arith.constant dense<0.000000e+00> : vector<16xf32>
    %86 = vector.multi_reduction <add>, %85, %cst_42 [1] : vector<16x16xf32> to vector<16xf32>
    %87 = vector.shape_cast %86 : vector<16xf32> to vector<16x1xf32>
    %88 = vector.broadcast %87 : vector<16x1xf32> to vector<16x16xf32>
    %89 = arith.divf %85, %88 : vector<16x16xf32>
    %cst_43 = arith.constant dense<0.000000e+00> : vector<16x8xf32>
    %90 = tpu.matmul %89, %77, %cst_43 {dimension_numbers = #tpu.dot_dimension_numbers<[1], [0], [0], [1], [0, 0, 1, 1], [], []>} : vector<16x16xf32>, vector<16x8xf32>, vector<16x8xf32> -> vector<16x8xf32>
    %91 = vector.extract_strided_slice %18 {offsets = [24, 0], sizes = [8, 64], strides = [1, 1]} : vector<32x64xf32> to vector<8x64xf32>
    %cst_44 = arith.constant dense<0.000000e+00> : vector<16x64xf32>
    %92 = tpu.matmul %90, %91, %cst_44 {dimension_numbers = #tpu.dot_dimension_numbers<[1], [0], [0], [1], [0, 0, 1, 1], [], []>} : vector<16x8xf32>, vector<8x64xf32>, vector<16x64xf32> -> vector<16x64xf32>
    %93 = arith.addf %74, %92 : vector<16x64xf32>
    %c0_45 = arith.constant 0 : index
    %c0_46 = arith.constant 0 : index
    %94 = vector.load %arg10[%c0_45, %c0_46] : memref<1x64xf32, #tpu.memory_space<vmem>>, vector<1x64xf32>
    %95 = vector.broadcast %94 : vector<1x64xf32> to vector<16x64xf32>
    %96 = arith.addf %93, %95 : vector<16x64xf32>
    %c0_47 = arith.constant 0 : index
    %c0_48 = arith.constant 0 : index
    %97 = vector.load %arg11[%c0_47, %c0_48] : memref<16x64xf32, #tpu.memory_space<vmem>>, vector<16x64xf32>
    tpu.vector_store %arg11[%c0_47, %c0_48], %96 {strides = array<i32>} : memref<16x64xf32, #tpu.memory_space<vmem>>, vector<16x64xf32>,
    return
  }
}

</mosaic_0001>

<bundles_post_ra>
// kernel: tpu_custom_call.1
= control target key start
LH: loop header
LB: loop body
LE: loop exit
PB: predicated region body
PF: predicated region fallthrough
CT: control target
= control target key end

     0   :  { %vm153_vm0 = vcmask 523264   ;;  %vm56_vm1 = vcmask 261120   ;;  %s2209_s0 = inlined_call_operand.vmem [shape: f32[16,32], index: 0, kind: input, shape index: {}]   ;;  %s2210_s1 = inlined_call_operand.vmem [shape: f32[16,64], index: 1, kind: input, shape index: {}]   ;;  %s2211_s2 = inlined_call_operand.vmem [shape: f32[16,64], index: 2, kind: input, shape index: {}]   ;;  %s2212_s3 = inlined_call_operand.vmem [shape: f32[32,32], index: 3, kind: input, shape index: {}]   ;;  %s2213_s4 = inlined_call_operand.vmem [shape: f32[1,32], index: 4, kind: input, shape index: {}]   ;;  %s2214_s5 = inlined_call_operand.vmem [shape: f32[64,32], index: 5, kind: input, shape index: {}]   ;;  %s2215_s6 = inlined_call_operand.vmem [shape: f32[1,32], index: 6, kind: input, shape index: {}]   ;;  %s2216_s7 = inlined_call_operand.vmem [shape: f32[64,32], index: 7, kind: input, shape index: {}]   ;;  %s2217_s8 = inlined_call_operand.vmem [shape: f32[1,32], index: 8, kind: input, shape index: {}]   ;;  %s2218_s9 = inlined_call_operand.vmem [shape: f32[32,64], index: 9, kind: input, shape index: {}]   ;;  %s2219_s10 = inlined_call_operand.vmem [shape: f32[1,64], index: 10, kind: input, shape index: {}]   ;;  %s2220_s11 = inlined_call_operand.hbm [shape: f32[16,64], index: 11, kind: output, shape index: {}]  }
   0x1   :  { %v138_v0 = vld [vmem:[%s2214_s5] sm:$0xff]  ;;  %v139_v1 = vld [vmem:[%s2214_s5 + $0x8] sm:$0xff]  ;;  %v140_v2 = vld [vmem:[%s2214_s5 + $0x10] sm:$0xff] }
   0x2   :  { %v1737_v3 = vpack.c.bf16 %v139_v1, %v138_v0  ;;  %v141_v4 = vld [vmem:[%s2214_s5 + $0x18] sm:$0xff]  ;;  %v142_v6 = vld [vmem:[%s2214_s5 + $0x20] sm:$0xff]  ;;  %v143_v7 = vld [vmem:[%s2214_s5 + $0x28] sm:$0xff] }
   0x3   :  { %v1741_v5 = vpack.c.bf16 %v141_v4, %v140_v2  ;;  %v41_v8 = vld [vmem:[%s2210_s1] sm:$0xff]  ;;  %v46_v10 = vld [vmem:[%s2212_s3 + $0x8] sm:$0xff]  ;;  %v47_v12 = vld [vmem:[%s2212_s3 + $0x10] sm:$0xff]  ;;  %v1745_v15 = vpack.c.bf16 %v143_v7, %v142_v6 }
   0x4   :  { %1738 = vmatprep.subr.bf16.mxu1 %v1737_v3  ;;  %1631 = vmatprep.mubr.msk.f32.mxu1 %vm153_vm0, %v41_v8  ;;  %v45_v9 = vld [vmem:[%s2212_s3] sm:$0xff]  ;;  %v48_v13 = vld [vmem:[%s2212_s3 + $0x18] sm:$0xff] }
   0x5   :  { %1740 = vmatpush3.bf16.msra.mxu1 %v1737_v3  ;;  %v1729_v11 = vpack.c.bf16 %v46_v10, %v45_v9  ;;  %v39_v14 = vld [vmem:[%s2209_s0] sm:$0xff]  ;;  %v1733_v16 = vpack.c.bf16 %v48_v13, %v47_v12 }
   0x6   :  { %1742 = vmatprep.subr.bf16.mxu1 %v1741_v5  ;;  %1612 = vmatprep.mubr.msk.f32.mxu0 %vm56_vm1, %v39_v14 }
   0x7   :  { %16 = vsyncpa [#allocation3], 0  ;;  %v144_v17 = vld [vmem:[%s2214_s5 + $0x30] sm:$0xff]  ;;  %v145_v18 = vld [vmem:[%s2214_s5 + $0x38] sm:$0xff]  ;;  %1730 = vmatprep.subr.bf16.mxu0 %v1729_v11  ;;  %vm335_vm2 = vcmask 64512   ;;  %s1907_s28 = smov 120  }
   0x8   :  { %1732 = vmatpush3.bf16.msra.mxu0 %v1729_v11  ;;  %v1749_v19 = vpack.c.bf16 %v145_v18, %v144_v17  ;;  %v40_v20 = vld [vmem:[%s2209_s0 + $0x8] sm:$0xff]  ;;  %v235_v22 = vld [vmem:[%s2216_s7] sm:$0xff]  ;;  %v237_v24 = vld [vmem:[%s2216_s7 + $0x10] sm:$0xff]  ;;  %vm425_vm4 = vcmask 130048   ;;  %s1908_s5 = smov 112  }
   0x9   :  { %1744 = vmatpush3.bf16.msra.mxu1 %v1741_v5  ;;  %1734 = vmatprep.subr.bf16.mxu0 %v1733_v16  ;;  %v42_v21 = vld [vmem:[%s2210_s1 + $0x8] sm:$0xff]  ;;  %v238_v26 = vld [vmem:[%s2216_s7 + $0x18] sm:$0xff]  ;;  %v239_v28 = vld [vmem:[%s2216_s7 + $0x20] sm:$0xff] }
   0xa   :  { %1746 = vmatprep.subr.bf16.mxu1 %v1745_v15  ;;  %v236_v23 = vld [vmem:[%s2216_s7 + $0x8] sm:$0xff]  ;;  %v1757_v27 = vpack.c.bf16 %v238_v26, %v237_v24  ;;  %v43_v30 = vld [vmem:[%s2211_s2] sm:$0xff]  ;;  %v241_v32 = vld [vmem:[%s2216_s7 + $0x30] sm:$0xff] }
   0xb   :  { %v1753_v25 = vpack.c.bf16 %v236_v23, %v235_v22  ;;  %v240_v29 = vld [vmem:[%s2216_s7 + $0x28] sm:$0xff]  ;;  %v242_v33 = vld [vmem:[%s2216_s7 + $0x38] sm:$0xff]  ;;  %v1492_v34 = vld [vmem:[%s2213_s4] ss:$0 sm:$0xff] }
   0xc   :  { %1736 = vmatpush3.bf16.msra.mxu0 %v1733_v16  ;;  %v1761_v31 = vpack.c.bf16 %v240_v29, %v239_v28  ;;  %v1765_v35 = vpack.c.bf16 %v242_v33, %v241_v32  ;;  %v1495_v39 = vld [vmem:[%s2215_s6] ss:$0 sm:$0xff]  ;;  %v44_v43 = vld [vmem:[%s2211_s2 + $0x8] sm:$0xff]  ;;  %vm2070_vm3 = vmpackc.low %vm335_vm2, %vm335_vm2 }
   0xd   :  { %1748 = vmatpush3.bf16.msra.mxu1 %v1745_v15  ;;  %1754 = vmatprep.subr.bf16.mxu0 %v1753_v25  ;;  %v1498_v56 = vld [vmem:[%s2217_s8] ss:$0 sm:$0xff]  ;;  %s1909_s8 = smov 104  }
   0xe   :  { %1750 = vmatprep.subr.bf16.mxu1 %v1749_v19 }
   0xf   :  { %1613 = vmatmul.mubr.msk.f32.vlgmr.msra.gmra.mrb[0].mxu0 %vm56_vm1, %v40_v20 }
  0x10   :  { %1650 = vmatprep.mubr.msk.f32.mxu0 %vm153_vm0, %v43_v30  ;;  %1756 = vmatpush3.bf16.msra.mxu0 %v1753_v25 }
  0x11   :  { %1752 = vmatpush3.bf16.msra.mxu1 %v1749_v19  ;;  %1758 = vmatprep.subr.bf16.mxu0 %v1757_v27 }
  0x14   :  { %1632 = vmatmul.mubr.msk.f32.vlgmr.msra.gmra.mrb[0].mxu1 %vm153_vm0, %v42_v21  ;;  %1760 = vmatpush3.bf16.msra.mxu0 %v1757_v27 }
  0x15   :  { %1762 = vmatprep.subr.bf16.mxu0 %v1761_v31 }
  0x18   :  { %1764 = vmatpush3.bf16.msra.mxu0 %v1761_v31 }
  0x19   :  { %1766 = vmatprep.subr.bf16.mxu0 %v1765_v35 }
  0x1c   :  { %1768 = vmatpush3.bf16.msra.mxu0 %v1765_v35 }
  0x1f   :  { %1651 = vmatmul.mubr.msk.f32.vlgmr.msra.gmra.mrb[2].mxu0 %vm153_vm0, %v44_v43 }
  0xe2   :  { %v1614_v36 = vpop.f32.mrb[0].mxu0 }
  0xe3   :  { %v129_v37 = vpop.f32.mrb[1].mxu0  ;;  %v2081_v48 = vadd.f32 %v1614_v36, %v1492_v34 }
  0xe4   :  { %v2056_v38 = vadd.f32 %v1492_v34, %v129_v37 }
  0xe6   :  { %529 = vrot.lane.b32.xlu1 %v2056_v38, %s1907_s28  ;;  %1657 = vmatprep.mubr.msk.f32.mxu1 %vm335_vm2, %v2056_v38 }
  0xe7   :  { %v1633_v40 = vpop.f32.mrb[0].mxu1 }
  0xe8   :  { %v232_v41 = vadd.f32 %v1633_v40, %v1495_v39  ;;  %v226_v42 = vpop.f32.mrb[1].mxu1 }
  0xe9   :  { %v227_v44 = vadd.f32 %v1495_v39, %v226_v42 }
  0xeb   :  { %v1769_v46 = vpack.c.bf16 %v232_v41, %v227_v44  ;;  %v2075_v47 = vpack.i.bf16 %v232_v41, %v227_v44 }
  0xed   :  { %1771 = vmatprep.subr.msk.bf16.mxu1 %vm2070_vm3, %v1769_v46 }
  0xee   :  { %1774 = vmatpush3.bf16.xpose.msk.msra.mxu1 %vm2070_vm3, %v1769_v46 }
  0xf2   :  { %v1652_v55 = vpop.f32.mrb[2].mxu0 }
  0xf3   :  { %v322_v57 = vpop.f32.mrb[3].mxu0  ;;  %v2090_v58 = vadd.f32 %v1652_v55, %v1498_v56 }
  0xf4   :  { %v2092_v59 = vadd.f32 %v1498_v56, %v322_v57 }
  0xf5   :  { %1658 = vmatmul.mubr.msk.f32.vlgmr.msra.gmra.mrb[2].mxu1 %vm335_vm2, %v2081_v48 }
  0xf6   :  { %v1775_v60 = vpack.c.bf16 %v2090_v58, %v2092_v59 }
  0xf8   :  { %1776 = vmatprep.subr.bf16.mxu1 %v1775_v60 }
  0xf9   :  { %1778 = vmatpush3.bf16.msra.mxu1 %v1775_v60 }
 0x158   :  { %v530_v11 = vpop.permute.xlu1 %529 }
 0x1c8   :  { %v1659_v49 = vpop.f32.mrb[2].mxu1 }
 0x1c9   :  { %v414_v50 = vpop.f32.mrb[3].mxu1  ;;  %v424_v52 = vmul.f32 0.35355338, %v1659_v49 }
 0x1ca   :  { %v423_v51 = vmul.f32 0.35355338, %v414_v50 }
 0x1cb   :  { %v429_v54 = vsel %vm425_vm4, %v424_v52, -inf }
 0x1cc   :  { %v426_v53 = vsel %vm425_vm4, %v423_v51, -inf }
 0x1cd   :  { %427 = vmax.xlane.f32.xlu0 %v426_v53 }
 0x1d1   :  { %430 = vmax.xlane.f32.xlu0 %v429_v54  ;;  %v2145_v54 = vpack.i.bf16 %v2090_v58, %v2092_v59 }
 0x1e7   :  { %1822 = vrot.lane.b32.xlu0 %v2075_v47, %s1907_s28 }
 0x1eb   :  { %895 = vrot.lane.b32.xlu0 %v2056_v38, %s1908_s5 }
 0x25a   :  { %v428_v61 = vpop.xlane.xlu0 %427 }
 0x25b   :  { %v432_v62 = vsub.f32 %v423_v51, %v428_v61 }
 0x25d   :  { %v434_v1 = vmul.f32 1.442695, %v432_v62 }
 0x25e   :  { %v431_v63 = vpop.xlane.xlu0 %430 }
 0x25f   :  { %v433_v0 = vsub.f32 %v424_v52, %v431_v63 }
 0x261   :  { %v436_v2 = vmul.f32 1.442695, %v433_v0 }
 0x262   :  { %v1823_v3 = vpop.permute.xlu0 %1822 }
 0x263   :  { %1851 = vpow2.f32 %v436_v2  ;;  %v1825_v4 = vunpack.i.h.bf16 %v1823_v3  ;;  %v1824_v5 = vunpack.i.l.bf16 %v1823_v3 }
 0x264   :  { %1853 = vpow2.f32 %v434_v1 }
 0x265   :  { %v1779_v6 = vpack.c.bf16 %v1825_v4, %v1824_v5 }
 0x266   :  { %v896_v23 = vpop.permute.xlu0 %895 }
 0x267   :  { %1781 = vmatprep.subr.msk.bf16.mxu1 %vm2070_vm3, %v1779_v6 }
 0x26d   :  { %v1852_v7 = vpop.eup %1851 }
 0x26e   :  { %v441_v8 = vsel %vm425_vm4, %v1852_v7, 0.0  ;;  %v1854_v9 = vpop.eup %1853 }
 0x26f   :  { %442 = vadd.xlane.f32.xlu1 %v441_v8  ;;  %v438_v10 = vsel %vm425_vm4, %v1854_v9, 0.0 }
 0x273   :  { %439 = vadd.xlane.f32.xlu1 %v438_v10 }
 0x284   :  { %531 = vrot.lane.b32.xlu1 %v2081_v48, %s1907_s28 }
 0x288   :  { %1827 = vrot.lane.b32.xlu1 %v2075_v47, %s1908_s5 }
 0x28c   :  { %897 = vrot.lane.b32.xlu1 %v2081_v48, %s1908_s5 }
 0x2fc   :  { %v443_v12 = vpop.xlane.xlu1 %442 }
 0x2fd   :  { %1855 = vrcp.f32 %v443_v12 }
 0x300   :  { %v440_v13 = vpop.xlane.xlu1 %439 }
 0x301   :  { %1857 = vrcp.f32 %v440_v13 }
 0x304   :  { %v532_v14 = vpop.permute.xlu1 %531 }
 0x307   :  { %v1856_v16 = vpop.eup %1855 }
 0x308   :  { %v1828_v15 = vpop.permute.xlu1 %1827  ;;  %v447_v21 = vmul.f32 %v1856_v16, %v1852_v7 }
 0x309   :  { %v1830_v18 = vunpack.i.h.bf16 %v1828_v15  ;;  %v1829_v19 = vunpack.i.l.bf16 %v1828_v15 }
 0x30b   :  { %v1858_v17 = vpop.eup %1857  ;;  %v1789_v22 = vpack.c.bf16 %v1830_v18, %v1829_v19  ;;  %v332_v18 = vld [vmem:[%s2218_s9 + $0x8] sm:$0xff]  ;;  %v331_v19 = vld [vmem:[%s2218_s9] sm:$0xff] }
 0x30c   :  { %v445_v20 = vmul.f32 %v1858_v17, %v1854_v9  ;;  %v898_v24 = vpop.permute.xlu1 %897 }
 0x30e   :  { %1664 = vmatprep.mubr.msk.f32.mxu1 %vm425_vm4, %v445_v20 }
 0x30f   :  { %1665 = vmatmul.mubr.msk.f32.vlgmr.msra.gmra.mrb[4].mxu1 %vm425_vm4, %v447_v21 }
 0x310   :  { %1784 = vmatpush3.bf16.xpose.msk.msra.mxu1 %vm2070_vm3, %v1779_v6  ;;  %1671 = vmatprep.mubr.msk.f32.mxu1 %vm335_vm2, %v530_v11 }
 0x311   :  { %1791 = vmatprep.subr.msk.bf16.mxu1 %vm2070_vm3, %v1789_v22 }
 0x317   :  { %1672 = vmatmul.mubr.msk.f32.vlgmr.msra.gmra.mrb[6].mxu1 %vm335_vm2, %v532_v14 }
 0x318   :  { %1794 = vmatpush3.bf16.xpose.msk.msra.mxu1 %vm2070_vm3, %v1789_v22  ;;  %1695 = vmatprep.mubr.msk.f32.mxu1 %vm335_vm2, %v896_v23 }
 0x31f   :  { %1696 = vmatmul.mubr.msk.f32.vlgmr.msra.gmra.mrb[8].mxu1 %vm335_vm2, %v898_v24 }
 0x3e2   :  { %v2122_v25 = vpop.f32.mrb[4].mxu1 }
 0x3e3   :  { %v2124_v26 = vpop.f32.mrb[5].mxu1 }
 0x3ea   :  { %v1673_v27 = vpop.f32.mrb[6].mxu1 }
 0x3eb   :  { %v621_v28 = vmul.f32 0.35355338, %v1673_v27  ;;  %v611_v29 = vpop.f32.mrb[7].mxu1 }
 0x3ec   :  { %v620_v30 = vmul.f32 0.35355338, %v611_v29 }
 0x3ed   :  { %v625_v31 = vsel %vm425_vm4, %v621_v28, -inf }
 0x3ee   :  { %626 = vmax.xlane.f32.xlu1 %v625_v31  ;;  %v622_v32 = vsel %vm425_vm4, %v620_v30, -inf }
 0x3ef   :  { %623 = vmax.xlane.f32.xlu0 %v622_v32 }
 0x3f2   :  { %v1697_v33 = vpop.f32.mrb[8].mxu1 }
 0x3f3   :  { %v977_v34 = vpop.f32.mrb[9].mxu1  ;;  %v987_v35 = vmul.f32 0.35355338, %v1697_v33 }
 0x3f4   :  { %v986_v57 = vmul.f32 0.35355338, %v977_v34 }
 0x3f5   :  { %v991_v36 = vsel %vm425_vm4, %v987_v35, -inf }
 0x3f6   :  { %v988_v60 = vsel %vm425_vm4, %v986_v57, -inf }
 0x3ff   :  { %1837 = vrot.lane.b32.xlu1 %v2075_v47, %s1909_s8 }
 0x403   :  { %1180 = vrot.lane.b32.xlu1 %v2056_v38, %s1909_s8 }
 0x407   :  { %1182 = vrot.lane.b32.xlu1 %v2081_v48, %s1909_s8 }
 0x42b   :  { %992 = vmax.xlane.f32.xlu1 %v991_v36 }
 0x47b   :  { %v627_v37 = vpop.xlane.xlu1 %626 }
 0x47c   :  { %v629_v39 = vsub.f32 %v621_v28, %v627_v37  ;;  %v624_v40 = vpop.xlane.xlu0 %623 }
 0x47d   :  { %v628_v41 = vsub.f32 %v620_v30, %v624_v40 }
 0x47e   :  { %v632_v42 = vmul.f32 1.442695, %v629_v39 }
 0x47f   :  { %v630_v43 = vmul.f32 1.442695, %v628_v41  ;;  %v1838_v44 = vpop.permute.xlu1 %1837 }
 0x480   :  { %1859 = vpow2.f32 %v632_v42  ;;  %v1840_v46 = vunpack.i.h.bf16 %v1838_v44  ;;  %v1839_v47 = vunpack.i.l.bf16 %v1838_v44  ;;  %v333_v44 = vld [vmem:[%s2218_s9 + $0x10] sm:$0xff] }
 0x481   :  { %1861 = vpow2.f32 %v630_v43 }
 0x482   :  { %v1799_v49 = vpack.c.bf16 %v1840_v46, %v1839_v47 }
 0x483   :  { %v1181_v38 = vpop.permute.xlu1 %1180 }
 0x484   :  { %1801 = vmatprep.subr.msk.bf16.mxu1 %vm2070_vm3, %v1799_v49  ;;  %1714 = vmatprep.mubr.msk.f32.mxu1 %vm335_vm2, %v1181_v38 }
 0x485   :  { %1804 = vmatpush3.bf16.xpose.msk.msra.mxu1 %vm2070_vm3, %v1799_v49 }
 0x487   :  { %v1183_v50 = vpop.permute.xlu1 %1182 }
 0x48a   :  { %v1860_v48 = vpop.eup %1859 }
 0x48b   :  { %v637_v51 = vsel %vm425_vm4, %v1860_v48, 0.0  ;;  %v1862_v52 = vpop.eup %1861 }
 0x48c   :  { %1715 = vmatmul.mubr.msk.f32.vlgmr.msra.gmra.mrb[10].mxu1 %vm335_vm2, %v1183_v50  ;;  %638 = vadd.xlane.f32.xlu0 %v637_v51  ;;  %v634_v53 = vsel %vm425_vm4, %v1862_v52, 0.0 }
 0x490   :  { %635 = vadd.xlane.f32.xlu0 %v634_v53 }
 0x4a6   :  { %1832 = vrot.lane.b32.xlu0 %v2145_v54, %s1907_s28 }
 0x4b8   :  { %v993_v45 = vpop.xlane.xlu1 %992 }
 0x4b9   :  { %v995_v55 = vsub.f32 %v987_v35, %v993_v45  ;;  %v334_v45 = vld [vmem:[%s2218_s9 + $0x18] sm:$0xff]  ;;  %s1910_s9 = smov [#allocation2]  }
 0x4ba   :  { %s1481_s18 = sshll.u32 %s1910_s9, 4  ;;  %s1482_s18 = int_to_ptr.vmem [resolvable:$true] %s1481_s18 }
 0x4bb   :  { %v998_v56 = vmul.f32 1.442695, %v995_v55  ;;  %s1883_s19 = scalar_lea.vmem %s1482_s18, 256  ;;  %p1888_p1 = scmp.lt.s32.totalorder %s1482_s18, %s1482_s18 }
 0x4bc   :  { %p1884_p0 = scmp.ne.s32.totalorder %s1482_s18, %s1883_s19  ;;  %p1889_p2 = scmp.lt.s32.totalorder %s1883_s19, %s1883_s19 }
 0x4bd   :  { %1863 = vpow2.f32 %v998_v56 }
 0x4be   :  { %p1890_p3 = por %p1889_p2, %p1888_p1 }
 0x4c0   :  { %p1891_p4 = pnand %p1890_p3, %p1884_p0 }
 0x4c5   :  { %989 = vmax.xlane.f32.xlu0 %v988_v60  ;;  %v1533_v60 = vld [vmem:[%s2219_s10] ss:$0 sm:$0xff] }
 0x4c7   :  { %v2150_v61 = vpop.eup %1863 }
 0x4c8   :  { %v1003_v62 = vsel %vm425_vm4, %v2150_v61, 0.0 }
 0x4c9   :  { %1004 = vadd.xlane.f32.xlu0 %v1003_v62 }
 0x519   :  { %v639_v63 = vpop.xlane.xlu0 %638 }
 0x51a   :  { %1865 = vrcp.f32 %v639_v63 }
 0x51d   :  { %v636_v58 = vpop.xlane.xlu0 %635 }
 0x51e   :  { %1867 = vrcp.f32 %v636_v58 }
 0x521   :  { %v1833_v59 = vpop.permute.xlu0 %1832 }
 0x522   :  { %v1835_v0 = vunpack.i.h.bf16 %v1833_v59  ;;  %v1834_v1 = vunpack.i.l.bf16 %v1833_v59 }
 0x524   :  { %v1785_v2 = vpack.c.bf16 %v1835_v0, %v1834_v1  ;;  %v1866_v3 = vpop.eup %1865 }
 0x525   :  { %v643_v6 = vmul.f32 %v1866_v3, %v1860_v48 }
 0x526   :  { %1786 = vmatprep.subr.bf16.mxu0 %v1785_v2 }
 0x527   :  { %1788 = vmatpush3.bf16.msra.mxu0 %v1785_v2 }
 0x528   :  { %v1868_v4 = vpop.eup %1867  ;;  %1681 = vmatprep.subr.mxu0 %v332_v18 }
 0x529   :  { %v641_v5 = vmul.f32 %v1868_v4, %v1862_v52 }
 0x52b   :  { %1678 = vmatprep.mubr.msk.f32.mxu0 %vm425_vm4, %v641_v5 }
 0x52c   :  { %1679 = vmatmul.mubr.msk.f32.vlgmr.msra.gmra.mrb[4].mxu0 %vm425_vm4, %v643_v6 }
 0x52d   :  { %1682 = vmatpush3.msra.mxu0 %v332_v18 }
 0x52e   :  { %1686 = vmatprep.subr.mxu0 %v331_v19 }
 0x552   :  { %v990_v7 = vpop.xlane.xlu0 %989 }
 0x553   :  { %v994_v8 = vsub.f32 %v986_v57, %v990_v7 }
 0x555   :  { %v996_v9 = vmul.f32 1.442695, %v994_v8 }
 0x556   :  { %v1005_v20 = vpop.xlane.xlu0 %1004 }
 0x557   :  { %1869 = vpow2.f32 %v996_v9 }
 0x55f   :  { %v1716_v10 = vpop.f32.mrb[10].mxu1 }
 0x560   :  { %v1262_v11 = vpop.f32.mrb[11].mxu1  ;;  %v1272_v15 = vmul.f32 0.35355338, %v1716_v10 }
 0x561   :  { %v1870_v12 = vpop.eup %1869  ;;  %v1271_v13 = vmul.f32 0.35355338, %v1262_v11 }
 0x562   :  { %v1000_v14 = vsel %vm425_vm4, %v1870_v12, 0.0  ;;  %v1276_v17 = vsel %vm425_vm4, %v1272_v15, -inf }
 0x563   :  { %1001 = vadd.xlane.f32.xlu0 %v1000_v14  ;;  %v1273_v16 = vsel %vm425_vm4, %v1271_v13, -inf }
 0x564   :  { %1274 = vmax.xlane.f32.xlu1 %v1273_v16 }
 0x568   :  { %1277 = vmax.xlane.f32.xlu1 %v1276_v17 }
 0x579   :  { %1842 = vrot.lane.b32.xlu0 %v2145_v54, %s1908_s5 }
 0x5f0   :  { %v1002_v23 = vpop.xlane.xlu0 %1001 }
 0x5f1   :  { %v1275_v21 = vpop.xlane.xlu1 %1274 }
 0x5f2   :  { %v1279_v22 = vsub.f32 %v1271_v13, %v1275_v21 }
 0x5f4   :  { %v1281_v28 = vmul.f32 1.442695, %v1279_v22  ;;  %v1843_v30 = vpop.permute.xlu0 %1842 }
 0x5f5   :  { %v1278_v24 = vpop.xlane.xlu1 %1277  ;;  %v1845_v31 = vunpack.i.h.bf16 %v1843_v30  ;;  %v1844_v32 = vunpack.i.l.bf16 %v1843_v30 }
 0x5f6   :  { %v1280_v27 = vsub.f32 %v1272_v15, %v1278_v24 }
 0x5f7   :  { %v1795_v35 = vpack.c.bf16 %v1845_v31, %v1844_v32 }
 0x5f8   :  { %v1283_v29 = vmul.f32 1.442695, %v1280_v27 }
 0x5fa   :  { %1871 = vpow2.f32 %v1283_v29 }
 0x5fb   :  { %1873 = vrcp.f32 %v1002_v23 }
 0x5fc   :  { %1875 = vpow2.f32 %v1281_v28 }
 0x5fd   :  { %1877 = vrcp.f32 %v1005_v20 }
 0x5ff   :  { %v1680_v33 = vpop.f32.mrb[4].mxu0 }
 0x600   :  { %v724_v34 = vpop.f32.mrb[5].mxu0 }
 0x601   :  { %1683 = vmatprep.mubr.msk.f32.mxu0 %vm335_vm2, %v724_v34 }
 0x602   :  { %1684 = vmatmul.mubr.msk.f32.vlgmr.msra.gmra.mrb[6].mxu0 %vm335_vm2, %v1680_v33 }
 0x603   :  { %1687 = vmatpush3.msra.mxu0 %v331_v19  ;;  %1688 = vmatprep.mubr.msk.f32.mxu0 %vm335_vm2, %v2124_v26 }
 0x604   :  { %v1872_v36 = vpop.eup %1871  ;;  %1796 = vmatprep.subr.bf16.mxu0 %v1795_v35 }
 0x605   :  { %v1874_v37 = vpop.eup %1873  ;;  %v1288_v39 = vsel %vm425_vm4, %v1872_v36, 0.0 }
 0x606   :  { %v1876_v40 = vpop.eup %1875  ;;  %1289 = vadd.xlane.f32.xlu1 %v1288_v39  ;;  %v1007_v43 = vmul.f32 %v1874_v37, %v1870_v12 }
 0x607   :  { %v1878_v41 = vpop.eup %1877  ;;  %v1285_v42 = vsel %vm425_vm4, %v1876_v40, 0.0 }
 0x608   :  { %v1009_v26 = vmul.f32 %v1878_v41, %v2150_v61 }
 0x60a   :  { %1286 = vadd.xlane.f32.xlu1 %v1285_v42  ;;  %1689 = vmatmul.mubr.msk.f32.vlgmr.msra.gmra.mrb[6].mxu0 %vm335_vm2, %v2122_v25 }
 0x60b   :  { %1798 = vmatpush3.bf16.msra.mxu0 %v1795_v35  ;;  %1702 = vmatprep.mubr.msk.f32.mxu0 %vm425_vm4, %v1007_v43 }
 0x60c   :  { %1705 = vmatprep.subr.mxu0 %v333_v44 }
 0x60e   :  { %1703 = vmatmul.mubr.msk.f32.vlgmr.msra.gmra.mrb[8].mxu0 %vm425_vm4, %v1009_v26 }
 0x60f   :  { %1706 = vmatpush3.msra.mxu0 %v333_v44 }
 0x61b   :  { %1847 = vrot.lane.b32.xlu1 %v2145_v54, %s1909_s8 }
 0x693   :  { %v1290_v46 = vpop.xlane.xlu1 %1289 }
 0x697   :  { %v1287_v47 = vpop.xlane.xlu1 %1286 }
 0x698   :  { %1879 = vrcp.f32 %v1287_v47 }
 0x699   :  { %1881 = vrcp.f32 %v1290_v46 }
 0x69b   :  { %v1848_v49 = vpop.permute.xlu1 %1847 }
 0x69c   :  { %v1850_v25 = vunpack.i.h.bf16 %v1848_v49  ;;  %v1849_v38 = vunpack.i.l.bf16 %v1848_v49 }
 0x69e   :  { %v1805_v48 = vpack.c.bf16 %v1850_v25, %v1849_v38 }
 0x6a0   :  { %1806 = vmatprep.subr.bf16.mxu0 %v1805_v48 }
 0x6a2   :  { %v1880_v50 = vpop.eup %1879 }
 0x6a3   :  { %v1882_v53 = vpop.eup %1881  ;;  %v1292_v54 = vmul.f32 %v1880_v50, %v1876_v40 }
 0x6a4   :  { %v1294_v55 = vmul.f32 %v1882_v53, %v1872_v36 }
 0x6e1   :  { %v1704_v51 = vpop.f32.mrb[8].mxu0 }
 0x6e2   :  { %v1088_v52 = vpop.f32.mrb[9].mxu0 }
 0x6e3   :  { %1707 = vmatprep.mubr.msk.f32.mxu0 %vm335_vm2, %v1088_v52 }
 0x6e4   :  { %1708 = vmatmul.mubr.msk.f32.vlgmr.msra.gmra.mrb[6].mxu0 %vm335_vm2, %v1704_v51 }
 0x6e5   :  { %1808 = vmatpush3.bf16.msra.mxu0 %v1805_v48  ;;  %1721 = vmatprep.mubr.msk.f32.mxu0 %vm425_vm4, %v1292_v54 }
 0x6e6   :  { %1724 = vmatprep.subr.mxu0 %v334_v45 }
 0x6e8   :  { %1722 = vmatmul.mubr.msk.f32.vlgmr.msra.gmra.mrb[10].mxu0 %vm425_vm4, %v1294_v55 }
 0x6e9   :  { %1725 = vmatpush3.msra.mxu0 %v334_v45 }
 0x7bb   :  { %v1723_v56 = vpop.f32.mrb[10].mxu0 }
 0x7bc   :  { %v1373_v57 = vpop.f32.mrb[11].mxu0 }
 0x7bd   :  { %1726 = vmatprep.mubr.msk.f32.mxu0 %vm335_vm2, %v1373_v57 }
 0x7be   :  { %1727 = vmatmul.mubr.msk.f32.vlgmr.msra.gmra.mrb[6].mxu0 %vm335_vm2, %v1723_v56 }
 0x891   :  { %v1728_v61 = vpop.f32.mrb[6].mxu0 }
 0x892   :  { %v1473_v62 = vadd.f32 %v1728_v61, %v1533_v60  ;;  %v1454_v63 = vpop.f32.mrb[7].mxu0 }
 0x893   :  { %v1472_v58 = vadd.f32 %v1533_v60, %v1454_v63 }
 0x894   :  { %1475 = vst.msk [vmem:[#allocation2 + $0x8] sm:$0xff] %vm153_vm0, %v1473_v62 }
 0x895   :  { %1474 = vst.msk [vmem:[#allocation2] sm:$0xff] %vm153_vm0, %v1472_v58 }
 0x896   :  { %1894 = shalt.err (!%p1891_p4)
}
 0x897   :  { %s1895_s21 = scalar_lea.hbm %s2220_s11, 256 }
 0x898   :  { %p1896_p5 = scmp.ne.s32.totalorder %s2220_s11, %s1895_s21  ;;  %p1899_p6 = scmp.lt.u32.totalorder %s1895_s21, %s2220_s11 }
 0x89a   :  { %p1901_p7 = pnand %p1899_p6, %p1896_p5 }
 0x89c   :  { %1904 = shalt.err (!%p1901_p7)
}
 0x89d   :  { %s1911_s3 = smov 128   ;;  %s1912_s26 = smov 8  }
 0x89e   :  { %1487 = dma.vmem_to_hbm [thread:$0]  %s1482_s18, 256, %s2220_s11, [#allocation3], %s1911_s3, %s1911_s3, %s1912_s26  }
 0x89f   :  { %1905 = dma.done.wait [#allocation3], 256  }
 0x8a0   :  { %1906 = vsyncadd [#allocation3], 4294967040 }
 0x8a1   :  { %1491 = vsyncpa [#allocation3], 1 }

</bundles_post_ra>
